<compile_context>
chip_gen: v5e
topology: v5e:2x2
jax: 0.10.0
libtpu: 0.0.40
codegen_flags: <defaults>
</compile_context>

<pallas_src>
import functools

import numpy as np
import jax
import jax.numpy as jnp
from jax.experimental import pallas as pl
from jax.experimental.pallas import tpu as pltpu

PAD = 8                       # max dilation; one global zero-pad serves all branches
TAPS = [(-1, -1), (-1, 0), (-1, 1),
        (0, -1), (0, 0), (0, 1),
        (1, -1), (1, 0), (1, 1)]
DILATIONS = (3, 5, 8)


# ----------------------------------------------------------------------------
# Host-side algebraic preprocessing (exact; done once per parameter set).
# ----------------------------------------------------------------------------
def prepare_aspp_params(params, H, W):
    C, D = np.asarray(params["w1"]).shape
    Wp = W + 2 * PAD
    WD, WpC = W * D, Wp * C

    wo = np.asarray(params["wo"], np.float32)                    # [5, D, D]
    wc_f = np.asarray(params["wc"], np.float32) @ wo[0]          # mean branch
    w1_f = np.asarray(params["w1"], np.float32) @ wo[1]          # 1x1 branch
    wdil_f = {3: np.asarray(params["w3"], np.float32) @ wo[2],   # [9, C, D]
              5: np.asarray(params["w5"], np.float32) @ wo[3],
              8: np.asarray(params["w8"], np.float32) @ wo[4]}

    # Fold all branch biases + output-conv bias into a single bias vector.
    bias = (np.asarray(params["bo"], np.float32)
            + np.asarray(params["bc"], np.float32) @ wo[0]
            + np.asarray(params["b1"], np.float32) @ wo[1]
            + np.asarray(params["b3"], np.float32) @ wo[2]
            + np.asarray(params["b5"], np.float32) @ wo[3]
            + np.asarray(params["b8"], np.float32) @ wo[4])      # [1, D]

    # Distinct row shifts over all taps/dilations (plus 0 for the 1x1 branch).
    shifts = sorted({ky * d for d in DILATIONS for ky in (-1, 0, 1)} | {0})
    sidx = {s: i for i, s in enumerate(shifts)}
    tmats = np.zeros((len(shifts), WpC, WD), np.float32)

    def add_tap(row_shift, col_shift, w_cd):                     # w_cd: [C, D]
        t = tmats[sidx[row_shift]]
        for x in range(W):
            win = x + PAD + col_shift          # column index in padded image
            t[win * C:(win + 1) * C, x * D:(x + 1) * D] += w_cd

    add_tap(0, 0, w1_f)                        # atrous_block1 (plain 1x1 conv)
    for d in DILATIONS:
        for t, (ky, kx) in enumerate(TAPS):
            add_tap(ky * d, kx * d, wdil_f[d][t])

    # Global-average-pool branch: (column-sum of padded image) @ mmat gives the
    # per-row constant contribution (bilinear upsample of a 1x1 source == const).
    mmat = np.zeros((WpC, WD), np.float32)
    for w in range(PAD, PAD + W):              # interior columns only
        for x in range(W):
            mmat[w * C:(w + 1) * C, x * D:(x + 1) * D] = wc_f / float(H * W)

    brow = np.tile(bias, (1, W))               # [1, W*D], bias tiled over x

    return dict(tmats=jnp.asarray(tmats), mmat=jnp.asarray(mmat),
                brow=jnp.asarray(brow), shifts=tuple(shifts), D=int(D))


# ----------------------------------------------------------------------------
# Kernel: one (batch, row-tile) grid step.
# ----------------------------------------------------------------------------
def _aspp_kernel(TH, shifts, xp_ref, t_ref, m_ref, b_ref, o_ref):
    # xp_ref : [Hp, Wp*C]      zero-padded image, (w, c) flattened into lanes
    # t_ref  : [S, Wp*C, W*D]  folded per-row-shift conv weights (Toeplitz)
    # m_ref  : [Wp*C, W*D]     global-average-pool branch matrix
    # b_ref  : [1, W*D]        folded bias row
    # o_ref  : [TH, W*D]       output row tile, (x, d) flattened into lanes
    y0 = pl.program_id(1) * TH

    # Mean branch: padded rows/cols are zero, so a full column-sum is exact.
    colsum = jnp.sum(xp_ref[...], axis=0, keepdims=True)            # [1, Wp*C]
    const_row = jnp.dot(colsum, m_ref[...],
                        preferred_element_type=jnp.float32) + b_ref[...]

    acc = None
    for i, s in enumerate(shifts):
        rows = xp_ref[pl.ds(y0 + (PAD + s), TH), :]                 # [TH, Wp*C]
        part = jnp.dot(rows, t_ref[i], preferred_element_type=jnp.float32)
        acc = part if acc is None else acc + part
    o_ref[...] = (acc + const_row).astype(o_ref.dtype)


# ----------------------------------------------------------------------------
# Wrapper (NCHW in / NCHW out, matching the PyTorch module).
# ----------------------------------------------------------------------------
def aspp_forward(x_nchw, params):
    N, C, H, W = x_nchw.shape
    prep = prepare_aspp_params(params, H, W)
    D = prep["D"]
    shifts = prep["shifts"]
    S = len(shifts)

    Hp, Wp = H + 2 * PAD, W + 2 * PAD
    WD, WpC = W * D, Wp * C

    # NHWC, zero-pad, flatten (w, c) into lanes -> lane-dense [N, Hp, Wp*C].
    x = jnp.transpose(x_nchw, (0, 2, 3, 1)).astype(jnp.float32)
    xp = jnp.pad(x, ((0, 0), (PAD, PAD), (PAD, PAD), (0, 0)))
    xp2 = xp.reshape(N, Hp, Wp * C)

    TH = 8 if (H % 8 == 0 and H > 8) else H      # output row-tile height
    HT = H // TH

    kernel = functools.partial(_aspp_kernel, TH, shifts)

    out2 = pl.pallas_call(
        kernel,
        out_shape=jax.ShapeDtypeStruct((N, H, WD), jnp.float32),
        grid=(N, HT),
        in_specs=[
            pl.BlockSpec((None, Hp, WpC), lambda n, h: (n, 0, 0)),   # image
            pl.BlockSpec((S, WpC, WD),   lambda n, h: (0, 0, 0)),    # Toeplitz
            pl.BlockSpec((WpC, WD),      lambda n, h: (0, 0)),       # mean mat
            pl.BlockSpec((1, WD),        lambda n, h: (0, 0)),       # bias row
        ],
        out_specs=pl.BlockSpec((None, TH, WD), lambda n, h: (n, h, 0)),
        compiler_params=pltpu.CompilerParams(
            dimension_semantics=("parallel", "parallel")),
    )(xp2, prep["tmats"], prep["mmat"], prep["brow"])

    out = out2.reshape(N, H, W, D)
    return jnp.transpose(out, (0, 3, 1, 2))      # -> NCHW


# ----------------------------------------------------------------------------
# Parameters & pure-JAX reference (lax convs) matching the PyTorch module.
# ----------------------------------------------------------------------------
def init_params(key, C, D):
    ks = jax.random.split(key, 12)

    def nrm(k, shape, scale=0.1):
        return scale * jax.random.normal(k, shape, jnp.float32)

    return dict(
        wc=nrm(ks[0], (C, D)), bc=nrm(ks[1], (1, D)),
        w1=nrm(ks[2], (C, D)), b1=nrm(ks[3], (1, D)),
        w3=nrm(ks[4], (9, C, D)), b3=nrm(ks[5], (1, D)),
        w5=nrm(ks[6], (9, C, D)), b5=nrm(ks[7], (1, D)),
        w8=nrm(ks[8], (9, C, D)), b8=nrm(ks[9], (1, D)),
        wo=nrm(ks[10], (5, D, D)), bo=nrm(ks[11], (1, D)),
    )


def aspp_ref(x_nchw, params):
    x = jnp.transpose(x_nchw, (0, 2, 3, 1))
    N, H, W, C = x.shape
    D = params["b1"].shape[-1]
    dn = ("NHWC", "HWIO", "NHWC")

    def conv(inp, w, b, dil, pad):
        y = jax.lax.conv_general_dilated(
            inp, w, (1, 1), [(pad, pad), (pad, pad)],
            rhs_dilation=(dil, dil), dimension_numbers=dn)
        return y + b.reshape(1, 1, 1, D)

    gm = jnp.mean(x, axis=(1, 2), keepdims=True)
    img = conv(gm, params["wc"].reshape(1, 1, C, D), params["bc"], 1, 0)
    img = jnp.broadcast_to(img, (N, H, W, D))   # bilinear(align_corners) from 1x1
    a1 = conv(x, params["w1"].reshape(1, 1, C, D), params["b1"], 1, 0)
    a3 = conv(x, params["w3"].reshape(3, 3, C, D), params["b3"], 3, 3)
    a5 = conv(x, params["w5"].reshape(3, 3, C, D), params["b5"], 5, 5)
    a8 = conv(x, params["w8"].reshape(3, 3, C, D), params["b8"], 8, 8)
    cat = jnp.concatenate([img, a1, a3, a5, a8], axis=-1)
    out = conv(cat, params["wo"].reshape(1, 1, 5 * D, D), params["bo"], 1, 0)
    return jnp.transpose(out, (0, 3, 1, 2))


if __name__ == "__main__":
    key = jax.random.PRNGKey(0)
    kx, kp = jax.random.split(key)

    N, C, H, W, depth = 2, 4, 16, 16, 8      # in_channel=4, depth=8
    x = jax.random.normal(kx, (N, C, H, W), jnp.float32)
    params = init_params(kp, C, depth)

    out = aspp_forward(x, params)
    jax.block_until_ready(out)

    ref = aspp_ref(x, params)
    assert out.shape == (N, depth, H, W), out.shape
    err = float(jnp.max(jnp.abs(out - ref)))
    assert jnp.allclose(out, ref, atol=1e-3, rtol=1e-3), err

    print("KERNEL_OK")
</pallas_src>

<mosaic_0001>
module attributes {stable_mosaic.version = 11 : i64} {
  func.func @_aspp_kernel(%arg0: i32, %arg1: i32, %arg2: memref<1x32x128xf32, #tpu.memory_space<vmem>>, %arg3: memref<7x128x128xf32, #tpu.memory_space<vmem>>, %arg4: memref<128x128xf32, #tpu.memory_space<vmem>>, %arg5: memref<1x128xf32, #tpu.memory_space<vmem>>, %arg6: memref<1x8x128xf32, #tpu.memory_space<vmem>>) attributes {dimension_semantics = [#tpu.dimension_semantics<parallel>, #tpu.dimension_semantics<parallel>], iteration_bounds = array<i64: 2, 2>, scalar_prefetch = 0 : i64, scratch_operands = 0 : i64, tpu.core_type = #tpu.core_type<tc>, window_params = [{transform_indices = @transform_0, window_bounds = array<i64: 1, 32, 128>}, {pipeline_mode = #tpu.pipeline_mode<synchronous>, transform_indices = @transform_1, window_bounds = array<i64: 7, 128, 128>}, {pipeline_mode = #tpu.pipeline_mode<synchronous>, transform_indices = @transform_2, window_bounds = array<i64: 128, 128>}, {pipeline_mode = #tpu.pipeline_mode<synchronous>, transform_indices = @transform_3, window_bounds = array<i64: 1, 128>}, {transform_indices = @transform_4, window_bounds = array<i64: 1, 8, 128>}]} {
    %c8_i32 = arith.constant 8 : i32
    %0 = arith.muli %arg1, %c8_i32 : i32
    %c0 = arith.constant 0 : index
    %c0_0 = arith.constant 0 : index
    %c0_1 = arith.constant 0 : index
    %1 = vector.load %arg2[%c0, %c0_0, %c0_1] : memref<1x32x128xf32, #tpu.memory_space<vmem>>, vector<1x32x128xf32>
    %2 = vector.shape_cast %1 : vector<1x32x128xf32> to vector<32x128xf32>
    %cst = arith.constant dense<0.000000e+00> : vector<128xf32>
    %3 = vector.multi_reduction <add>, %2, %cst [0] : vector<32x128xf32> to vector<128xf32>
    %4 = vector.shape_cast %3 : vector<128xf32> to vector<1x128xf32>
    %c0_2 = arith.constant 0 : index
    %c0_3 = arith.constant 0 : index
    %5 = vector.load %arg4[%c0_2, %c0_3] : memref<128x128xf32, #tpu.memory_space<vmem>>, vector<128x128xf32>
    %cst_4 = arith.constant dense<0.000000e+00> : vector<1x128xf32>
    %6 = tpu.matmul %4, %5, %cst_4 {dimension_numbers = #tpu.dot_dimension_numbers<[1], [0], [0], [1], [0, 0, 1, 1], [], []>} : vector<1x128xf32>, vector<128x128xf32>, vector<1x128xf32> -> vector<1x128xf32>
    %c0_5 = arith.constant 0 : index
    %c0_6 = arith.constant 0 : index
    %7 = vector.load %arg5[%c0_5, %c0_6] : memref<1x128xf32, #tpu.memory_space<vmem>>, vector<1x128xf32>
    %8 = arith.addf %6, %7 : vector<1x128xf32>
    %c0_i32 = arith.constant 0 : i32
    %9 = arith.addi %0, %c0_i32 : i32
    %c0_7 = arith.constant 0 : index
    %10 = arith.index_cast %9 : i32 to index
    %c0_8 = arith.constant 0 : index
    %11 = vector.load %arg2[%c0_7, %10, %c0_8] : memref<1x32x128xf32, #tpu.memory_space<vmem>>, vector<1x8x128xf32>
    %12 = vector.shape_cast %11 : vector<1x8x128xf32> to vector<8x128xf32>
    %c0_9 = arith.constant 0 : index
    %c0_10 = arith.constant 0 : index
    %c0_11 = arith.constant 0 : index
    %13 = vector.load %arg3[%c0_9, %c0_10, %c0_11] : memref<7x128x128xf32, #tpu.memory_space<vmem>>, vector<1x128x128xf32>
    %14 = vector.shape_cast %13 : vector<1x128x128xf32> to vector<128x128xf32>
    %cst_12 = arith.constant dense<0.000000e+00> : vector<8x128xf32>
    %15 = tpu.matmul %12, %14, %cst_12 {dimension_numbers = #tpu.dot_dimension_numbers<[1], [0], [0], [1], [0, 0, 1, 1], [], []>} : vector<8x128xf32>, vector<128x128xf32>, vector<8x128xf32> -> vector<8x128xf32>
    %c3_i32 = arith.constant 3 : i32
    %16 = arith.addi %0, %c3_i32 : i32
    %c0_13 = arith.constant 0 : index
    %17 = arith.index_cast %16 : i32 to index
    %c0_14 = arith.constant 0 : index
    %18 = vector.load %arg2[%c0_13, %17, %c0_14] : memref<1x32x128xf32, #tpu.memory_space<vmem>>, vector<1x8x128xf32>
    %19 = vector.shape_cast %18 : vector<1x8x128xf32> to vector<8x128xf32>
    %c1 = arith.constant 1 : index
    %c0_15 = arith.constant 0 : index
    %c0_16 = arith.constant 0 : index
    %20 = vector.load %arg3[%c1, %c0_15, %c0_16] : memref<7x128x128xf32, #tpu.memory_space<vmem>>, vector<1x128x128xf32>
    %21 = vector.shape_cast %20 : vector<1x128x128xf32> to vector<128x128xf32>
    %cst_17 = arith.constant dense<0.000000e+00> : vector<8x128xf32>
    %22 = tpu.matmul %19, %21, %cst_17 {dimension_numbers = #tpu.dot_dimension_numbers<[1], [0], [0], [1], [0, 0, 1, 1], [], []>} : vector<8x128xf32>, vector<128x128xf32>, vector<8x128xf32> -> vector<8x128xf32>
    %23 = arith.addf %15, %22 : vector<8x128xf32>
    %c5_i32 = arith.constant 5 : i32
    %24 = arith.addi %0, %c5_i32 : i32
    %c0_18 = arith.constant 0 : index
    %25 = arith.index_cast %24 : i32 to index
    %c0_19 = arith.constant 0 : index
    %26 = vector.load %arg2[%c0_18, %25, %c0_19] : memref<1x32x128xf32, #tpu.memory_space<vmem>>, vector<1x8x128xf32>
    %27 = vector.shape_cast %26 : vector<1x8x128xf32> to vector<8x128xf32>
    %c2 = arith.constant 2 : index
    %c0_20 = arith.constant 0 : index
    %c0_21 = arith.constant 0 : index
    %28 = vector.load %arg3[%c2, %c0_20, %c0_21] : memref<7x128x128xf32, #tpu.memory_space<vmem>>, vector<1x128x128xf32>
    %29 = vector.shape_cast %28 : vector<1x128x128xf32> to vector<128x128xf32>
    %cst_22 = arith.constant dense<0.000000e+00> : vector<8x128xf32>
    %30 = tpu.matmul %27, %29, %cst_22 {dimension_numbers = #tpu.dot_dimension_numbers<[1], [0], [0], [1], [0, 0, 1, 1], [], []>} : vector<8x128xf32>, vector<128x128xf32>, vector<8x128xf32> -> vector<8x128xf32>
    %31 = arith.addf %23, %30 : vector<8x128xf32>
    %c8_i32_23 = arith.constant 8 : i32
    %32 = arith.addi %0, %c8_i32_23 : i32
    %c0_24 = arith.constant 0 : index
    %33 = arith.index_cast %32 : i32 to index
    %c0_25 = arith.constant 0 : index
    %34 = vector.load %arg2[%c0_24, %33, %c0_25] : memref<1x32x128xf32, #tpu.memory_space<vmem>>, vector<1x8x128xf32>
    %35 = vector.shape_cast %34 : vector<1x8x128xf32> to vector<8x128xf32>
    %c3 = arith.constant 3 : index
    %c0_26 = arith.constant 0 : index
    %c0_27 = arith.constant 0 : index
    %36 = vector.load %arg3[%c3, %c0_26, %c0_27] : memref<7x128x128xf32, #tpu.memory_space<vmem>>, vector<1x128x128xf32>
    %37 = vector.shape_cast %36 : vector<1x128x128xf32> to vector<128x128xf32>
    %cst_28 = arith.constant dense<0.000000e+00> : vector<8x128xf32>
    %38 = tpu.matmul %35, %37, %cst_28 {dimension_numbers = #tpu.dot_dimension_numbers<[1], [0], [0], [1], [0, 0, 1, 1], [], []>} : vector<8x128xf32>, vector<128x128xf32>, vector<8x128xf32> -> vector<8x128xf32>
    %39 = arith.addf %31, %38 : vector<8x128xf32>
    %c11_i32 = arith.constant 11 : i32
    %40 = arith.addi %0, %c11_i32 : i32
    %c0_29 = arith.constant 0 : index
    %41 = arith.index_cast %40 : i32 to index
    %c0_30 = arith.constant 0 : index
    %42 = vector.load %arg2[%c0_29, %41, %c0_30] : memref<1x32x128xf32, #tpu.memory_space<vmem>>, vector<1x8x128xf32>
    %43 = vector.shape_cast %42 : vector<1x8x128xf32> to vector<8x128xf32>
    %c4 = arith.constant 4 : index
    %c0_31 = arith.constant 0 : index
    %c0_32 = arith.constant 0 : index
    %44 = vector.load %arg3[%c4, %c0_31, %c0_32] : memref<7x128x128xf32, #tpu.memory_space<vmem>>, vector<1x128x128xf32>
    %45 = vector.shape_cast %44 : vector<1x128x128xf32> to vector<128x128xf32>
    %cst_33 = arith.constant dense<0.000000e+00> : vector<8x128xf32>
    %46 = tpu.matmul %43, %45, %cst_33 {dimension_numbers = #tpu.dot_dimension_numbers<[1], [0], [0], [1], [0, 0, 1, 1], [], []>} : vector<8x128xf32>, vector<128x128xf32>, vector<8x128xf32> -> vector<8x128xf32>
    %47 = arith.addf %39, %46 : vector<8x128xf32>
    %c13_i32 = arith.constant 13 : i32
    %48 = arith.addi %0, %c13_i32 : i32
    %c0_34 = arith.constant 0 : index
    %49 = arith.index_cast %48 : i32 to index
    %c0_35 = arith.constant 0 : index
    %50 = vector.load %arg2[%c0_34, %49, %c0_35] : memref<1x32x128xf32, #tpu.memory_space<vmem>>, vector<1x8x128xf32>
    %51 = vector.shape_cast %50 : vector<1x8x128xf32> to vector<8x128xf32>
    %c5 = arith.constant 5 : index
    %c0_36 = arith.constant 0 : index
    %c0_37 = arith.constant 0 : index
    %52 = vector.load %arg3[%c5, %c0_36, %c0_37] : memref<7x128x128xf32, #tpu.memory_space<vmem>>, vector<1x128x128xf32>
    %53 = vector.shape_cast %52 : vector<1x128x128xf32> to vector<128x128xf32>
    %cst_38 = arith.constant dense<0.000000e+00> : vector<8x128xf32>
    %54 = tpu.matmul %51, %53, %cst_38 {dimension_numbers = #tpu.dot_dimension_numbers<[1], [0], [0], [1], [0, 0, 1, 1], [], []>} : vector<8x128xf32>, vector<128x128xf32>, vector<8x128xf32> -> vector<8x128xf32>
    %55 = arith.addf %47, %54 : vector<8x128xf32>
    %c16_i32 = arith.constant 16 : i32
    %56 = arith.addi %0, %c16_i32 : i32
    %c0_39 = arith.constant 0 : index
    %57 = arith.index_cast %56 : i32 to index
    %c0_40 = arith.constant 0 : index
    %58 = vector.load %arg2[%c0_39, %57, %c0_40] : memref<1x32x128xf32, #tpu.memory_space<vmem>>, vector<1x8x128xf32>
    %59 = vector.shape_cast %58 : vector<1x8x128xf32> to vector<8x128xf32>
    %c6 = arith.constant 6 : index
    %c0_41 = arith.constant 0 : index
    %c0_42 = arith.constant 0 : index
    %60 = vector.load %arg3[%c6, %c0_41, %c0_42] : memref<7x128x128xf32, #tpu.memory_space<vmem>>, vector<1x128x128xf32>
    %61 = vector.shape_cast %60 : vector<1x128x128xf32> to vector<128x128xf32>
    %cst_43 = arith.constant dense<0.000000e+00> : vector<8x128xf32>
    %62 = tpu.matmul %59, %61, %cst_43 {dimension_numbers = #tpu.dot_dimension_numbers<[1], [0], [0], [1], [0, 0, 1, 1], [], []>} : vector<8x128xf32>, vector<128x128xf32>, vector<8x128xf32> -> vector<8x128xf32>
    %63 = arith.addf %55, %62 : vector<8x128xf32>
    %64 = vector.broadcast %8 : vector<1x128xf32> to vector<8x128xf32>
    %65 = arith.addf %63, %64 : vector<8x128xf32>
    %c0_44 = arith.constant 0 : index
    %c0_45 = arith.constant 0 : index
    %c0_46 = arith.constant 0 : index
    %66 = vector.load %arg6[%c0_44, %c0_45, %c0_46] : memref<1x8x128xf32, #tpu.memory_space<vmem>>, vector<1x8x128xf32>
    %67 = vector.shape_cast %66 : vector<1x8x128xf32> to vector<8x128xf32>
    %68 = vector.shape_cast %65 : vector<8x128xf32> to vector<1x8x128xf32>
    tpu.vector_store %arg6[%c0_44, %c0_45, %c0_46], %68 {strides = array<i32>} : memref<1x8x128xf32, #tpu.memory_space<vmem>>, vector<1x8x128xf32>,
    return
  }
  func.func @transform_0(%arg0: i32, %arg1: i32) -> (i32, i32, i32) {
    %c0_i32 = arith.constant 0 : i32
    %c0_i32_0 = arith.constant 0 : i32
    %c0_i32_1 = arith.constant 0 : i32
    return %arg0, %c0_i32, %c0_i32_0 : i32, i32, i32
  }
  func.func @transform_1(%arg0: i32, %arg1: i32) -> (i32, i32, i32) {
    %c0_i32 = arith.constant 0 : i32
    %c0_i32_0 = arith.constant 0 : i32
    %c0_i32_1 = arith.constant 0 : i32
    %c0_i32_2 = arith.constant 0 : i32
    return %c0_i32, %c0_i32_0, %c0_i32_1 : i32, i32, i32
  }
  func.func @transform_2(%arg0: i32, %arg1: i32) -> (i32, i32) {
    %c0_i32 = arith.constant 0 : i32
    %c0_i32_0 = arith.constant 0 : i32
    %c0_i32_1 = arith.constant 0 : i32
    return %c0_i32, %c0_i32_0 : i32, i32
  }
  func.func @transform_3(%arg0: i32, %arg1: i32) -> (i32, i32) {
    %c0_i32 = arith.constant 0 : i32
    %c0_i32_0 = arith.constant 0 : i32
    %c0_i32_1 = arith.constant 0 : i32
    return %c0_i32, %c0_i32_0 : i32, i32
  }
  func.func @transform_4(%arg0: i32, %arg1: i32) -> (i32, i32, i32) {
    %c0_i32 = arith.constant 0 : i32
    %c0_i32_0 = arith.constant 0 : i32
    return %arg0, %arg1, %c0_i32 : i32, i32, i32
  }
}

</mosaic_0001>

<bundles_post_ra>
// kernel: tpu_custom_call.1
= control target key start
LH: loop header
LB: loop body
LE: loop exit
PB: predicated region body
PF: predicated region fallthrough
CT: control target
= control target key end

     0   :  { %s1370_s0 = inlined_call_operand.hbm [shape: f32[2,32,128], index: 0, kind: input, shape index: {}]   ;;  %s1371_s1 = inlined_call_operand.hbm [shape: f32[7,128,128], index: 1, kind: input, shape index: {}]   ;;  %s1372_s2 = inlined_call_operand.hbm [shape: f32[128,128], index: 2, kind: input, shape index: {}]   ;;  %s1373_s3 = inlined_call_operand.vmem [shape: f32[1,128], index: 3, kind: input, shape index: {}]   ;;  %s1374_s4 = inlined_call_operand.hbm [shape: f32[2,16,128], index: 4, kind: output, shape index: {}]  }
   0x1   :  { %1385 = sst [smem:[#allocation18_spill]] %s1371_s1 }
   0x2   :  { %1386 = sst [smem:[#allocation19_spill]] %s1372_s2 }
   0x3   :  { %1387 = sst [smem:[#allocation20_spill]] %s1374_s4 }
   0x4   :  { %9 = vsyncpa [#allocation3], 0 }
   0x5   :  { %11 = vsyncpa [#allocation3 + $0x1], 0 }
   0x6   :  { %12 = vsyncpa [#allocation6], 0 }
   0x7   :  { %13 = vsyncpa [#allocation4], 0 }
   0x8   :  { %15 = vsyncpa [#allocation4 + $0x1], 0  ;;  %s1147_s15 = smov 0   ;;  %s1149_s16 = smov 0  }
   0x9   :  { %s1151_s17 = smov 0   ;;  %s1153_s18 = smov 0  }
   0xa   :  { %s1155_s19 = smov 0   ;;  %s1157_s20 = smov 0  }
   0xb   :  { %s1159_s21 = smov 0   ;;  %s1161_s22 = smov 0  }
   0xc   :  { %s1163_s23 = smov 0   ;;  %s1165_s24 = smov 0  }
   0xd   :  { %s1167_s25 = smov 0  }
   0xe LB: > { %1388 = sst [smem:[#allocation12_spill]] %s1076_s15  ;;  %s742_s26 = sadd.s32 4294967295, %s1116_s25   ;;  %s1116_s25 = sphi %s1167_s25, %s21_s25   ;;  %s1112_s24 = sphi %s1165_s24, %s1418_s24   ;;  %s1108_s23 = sphi %s1163_s23, %s1409_s23   ;;  %s1104_s22 = sphi %s1161_s22, %s1417_s22   ;;  %s1100_s21 = sphi %s1159_s21, %s1408_s21   ;;  %s1096_s20 = sphi %s1157_s20, %s1416_s20   ;;  %s1092_s19 = sphi %s1155_s19, %s1415_s19   ;;  %s1088_s18 = sphi %s1153_s18, %s1414_s18   ;;  %s1084_s17 = sphi %s1151_s17, %s1413_s17   ;;  %s1080_s16 = sphi %s1149_s16, %s1412_s16   ;;  %s1076_s15 = sphi %s1147_s15, %s1411_s15  }
   0xf   : > { %1389 = sst [smem:[#allocation13_spill]] %s1108_s23  ;;  %s743_s27 = sadd.s32 4294967294, %s1116_s25  }
  0x10   : > { %p53_p0 = scmp.ne.s32.totalorder %s1092_s19, %s1088_s18  ;;  %p1203_p1 = scmp.eq.s32.totalorder %s742_s26, 0 }
  0x11   : > { %p141_p2 = scmp.ne.s32.totalorder %s1084_s17, %s1080_s16  ;;  %p142_p3 = scmp.eq.s32.totalorder %s742_s26, 3 }
  0x12   : > { %p1211_p4 = por %p1203_p1, %p53_p0  ;;  %p147_p5 = scmp.ne.s32.totalorder %s1080_s16, %s1076_s15 }
  0x13   : > { %p1217_p6 = por %p142_p3, %p141_p2  ;;  %p148_p7 = scmp.eq.s32.totalorder %s743_s27, 3 }
  0x14   : > { %p744_p8 = scmp.ge.s32.totalorder %s1116_s25, 1  ;;  %p155_p9 = scmp.lt.s32.totalorder %s1116_s25, 5 }
  0x15   : > { %s1392_s30 = scalar_select %p1217_p6, 1, 0 }
  0x16   : > { %p1223_p10 = por %p148_p7, %p147_p5  ;;  %p1227_p11 = pnand %p744_p8, %p155_p9 }
  0x17   : > { %1393 = sst [smem:[#allocation14_spill]] %s1392_s30  ;;  %s1118_s10 = smov [#allocation5]  }
  0x18   : > { %s1394_s5 = scalar_select %p1223_p10, 1, 0 }
  0x19   : > { %s1397_s1 = sld [smem:[#allocation18_spill]]  ;;  %p787_p12 = pneg %p1227_p11 }
  0x1a   : > { %1395 = sst [smem:[#allocation15_spill]] %s1394_s5  ;;  %s168_s11 = sshll.u32 %s1118_s10, 4  ;;  %s169_s11 = int_to_ptr.vmem [resolvable:$true] %s168_s11 }
  0x1b   : > { %p788_p13 = pnand %p787_p12, %p1203_p1  ;;  %s1398_s2 = sld [smem:[#allocation19_spill]] }
  0x1c   : > { %s1375_s18 = smov 128   ;;  %s1376_s26 = smov 8  }
  0x1d   : > { %s1121_s27 = smov [#allocation7]   ;;  %s30_s8 = sadd.s32 1, %s1108_s23 }
  0x1e   : > { %s182_s7 = sshll.u32 %s1121_s27, 4  ;;  %p31_p0 = scmp.ge.s32.totalorder %s30_s8, 2  ;;  %s183_s7 = int_to_ptr.vmem [resolvable:$true] %s182_s7 }
  0x1f   : > { %s166_s9 = sshll.u32 %s1397_s1, 4  ;;  %s33_s10 = sadd.s32 1, %s1112_s24  ;;  %s167_s9 = int_to_ptr.hbm [resolvable:$true] %s166_s9 }
  0x20   : > { %790 = dma.hbm_to_vmem [thread:$0]  (!%p788_p13), %s167_s9, 14336, %s169_s11, [#allocation6], %s1375_s18, %s1375_s18, %s1376_s26  }
  0x21   : > { %s180_s14 = sshll.u32 %s1398_s2, 4  ;;  %p47_p2 = scmp.ne.s32.totalorder %s1096_s20, %s1092_s19  ;;  %s181_s14 = int_to_ptr.hbm [resolvable:$true] %s180_s14 }
  0x22   : > { %793 = dma.hbm_to_vmem [thread:$0]  (!%p788_p13), %s181_s14, 2048, %s183_s7, [#allocation6], %s1375_s18, %s1375_s18, %s1376_s26  }
  0x23   : > { %s1420_s8 = smov (%p31_p0, %s30_s8), 0  ;;  %s1422_s10 = smov (!%p31_p0, %s33_s10), %s1112_s24 }
  0x24   : > { %1399 = sst [smem:[#allocation16_spill]] %s1420_s8  ;;  %s40_s9 = sadd.s32 1, %s1096_s20 }
  0x25   : > { %p48_p3 = scmp.eq.s32.totalorder %s1116_s25, 0  ;;  %p35_p5 = scmp.ge.s32.totalorder %s1422_s10, 2 }
  0x26   : > { %s127_s11 = ssub.s32 %s1108_s23, %s1420_s8  ;;  %s131_s13 = sadd.s32 1, %s1084_s17 }
  0x27   : > { %p1258_p7 = por %p48_p3, %p47_p2  ;;  %s1424_s10 = smov (%p35_p5, %s1422_s10), 0 }
  0x28   : > { %1401 = sst [smem:[#allocation17_spill]] %s1424_s10  ;;  %p804_p8 = scmp.lt.s32.totalorder %s1116_s25, 4 }
  0x29   : > { %s199_s14 = sand.u32 1, %s1096_s20   ;;  %s37_s27 = ssub.s32 %s1112_s24, %s1424_s10 }
  0x2a   : > { %s774_s7 = sshll.u32 %s1112_s24, 5  ;;  %p38_p9 = scmp.eq.s32.totalorder %s37_s27, 0 }
  0x2b   : > { %s128_s18 = sor.u32 %s127_s11, %s37_s27  ;;  %s748_s26 = sshll.u32 %s199_s14, 5 }
  0x2c   : > { %p129_p12 = scmp.eq.s32.totalorder %s128_s18, 0  ;;  %s208_s5 = scalar_lea.hbm %s1370_s0, %s774_s7 }
  0x2d   : > { %s1271_s1 = scalar_select %p38_p9, %s1096_s20, %s40_s9  }
  0x2e   : > { %s1274_s2 = scalar_select %p129_p12, %s1084_s17, %s131_s13  }
  0x2f   : > { %s209_s15 = sshll.u32 %s208_s5, 4  ;;  %s203_s30 = scalar_lea.vmem [#allocation2], %s748_s26  ;;  %s210_s15 = int_to_ptr.hbm [resolvable:$true] %s209_s15 }
  0x30   : > { %s211_s4 = sshll.u32 %s203_s30, 4  ;;  %p795_p13 = pnand %p804_p8, %p1258_p7  ;;  %s212_s4 = int_to_ptr.vmem [resolvable:$true] %s211_s4 }
  0x31   : > { %s200_s10 = scalar_lea.sflag [#allocation3], %s199_s14  ;;  %s1402_s11 = smov 8  }
  0x32   : > { %s1403_s18 = smov 128   ;;  %223 = sbr.rel (%p1227_p11) target bundleno = 266 (0x10a), region = 36 }
  0x33   : > { %797 = dma.hbm_to_vmem [thread:$0]  (!%p795_p13), %s210_s15, 512, %s212_s4, %s200_s10, %s1403_s18, %s1403_s18, %s1402_s11  }
  0x34   : > { %s225_s23 = sand.u32 (!%p1227_p11), 1, %s1092_s19  }
  0x35   : > { %s752_s8 = sshll.u32 (!%p1227_p11), %s225_s23, 5  ;;  %s226_s5 = scalar_lea.sflag (!%p1227_p11), [#allocation3], %s225_s23 }
  0x36   : > { %s1289_s26 = scalar_lea.vmem (!%p1227_p11), [#allocation2], %s752_s8 }
  0x37   : > { %1063 = dma.done.wait (%p1211_p4), %s226_s5, 512  }
  0x38   : > { %1065 = vsyncadd (%p1211_p4), %s226_s5, 4294966784 }
  0x39   : > { %1067 = dma.done.wait (%p1203_p1), [#allocation6], 16384  }
  0x3a   : > { %1069 = vsyncadd (%p1203_p1), [#allocation6], 4294950912  ;;  %v294_v0 = vld [vmem:[#allocation7 + $0x78] sm:$0xff]  ;;  %v293_v2 = vld [vmem:[#allocation7 + $0x70] sm:$0xff]  ;;  %s756_s4 = sshll.u32 %s1100_s21, 3  ;;  %s770_s28 = sshll.u32 %s1104_s22, 1 }
  0x3b   : > { %v333_v1 = vld [vmem:[#allocation5 + $0x78] sm:$0xff]  ;;  %296 = vmatpush.msra.mxu0 %v294_v0  ;;  %v332_v4 = vld [vmem:[#allocation5 + $0x70] sm:$0xff]  ;;  %v292_v6 = vld [vmem:[#allocation7 + $0x68] sm:$0xff]  ;;  %s1305_s15 = scalar_lea.vmem %s1289_s26, %s756_s4 [#allocation2]  ;;  %s262_s29 = sand.u32 1, %s1080_s16  }
  0x3c   : > { %374 = vmatpush.msra.mxu2 %v333_v1  ;;  %v353_v3 = vld [vmem:[#allocation5 + $0xf8] sm:$0xff]  ;;  %v352_v7 = vld [vmem:[#allocation5 + $0xf0] sm:$0xff]  ;;  %v331_v8 = vld [vmem:[#allocation5 + $0x68] sm:$0xff]  ;;  %s613_s30 = sadd.s32 %s1100_s21, %s770_s28  ;;  %s755_s9 = sshll.u32 %s262_s29, 3 }
  0x3d   : > { %v413_v5 = vld [vmem:[#allocation5 + $0x178] sm:$0xff]  ;;  %354 = vmatpush.msra.mxu1 %v353_v3  ;;  %297 = vmatpush.msra.mxu0 %v293_v2  ;;  %v412_v9 = vld [vmem:[#allocation5 + $0x170] sm:$0xff]  ;;  %v351_v10 = vld [vmem:[#allocation5 + $0xe8] sm:$0xff]  ;;  %s771_s12 = sshll.u32 %s613_s30, 3  ;;  %s1404_s27 = sld [smem:[#allocation20_spill]] }
  0x3e   : > { %414 = vmatpush.msra.mxu3 %v413_v5  ;;  %375 = vmatpush.msra.mxu2 %v332_v4  ;;  %v291_v11 = vld [vmem:[#allocation7 + $0x60] sm:$0xff]  ;;  %v411_v13 = vld [vmem:[#allocation5 + $0x168] sm:$0xff]  ;;  %v290_v16 = vld [vmem:[#allocation7 + $0x58] sm:$0xff]  ;;  %s264_s21 = scalar_lea.vmem [#allocation8], %s755_s9  ;;  %s603_s23 = scalar_lea.sflag [#allocation4], %s262_s29 }
  0x3f   : > { %355 = vmatpush.msra.mxu1 %v352_v7  ;;  %v330_v12 = vld [vmem:[#allocation5 + $0x60] sm:$0xff]  ;;  %298 = vmatpush.msra.mxu0 %v292_v6  ;;  %v329_v17 = vld [vmem:[#allocation5 + $0x58] sm:$0xff]  ;;  %v289_v20 = vld [vmem:[#allocation7 + $0x50] sm:$0xff]  ;;  %s617_s11 = sshll.u32 %s264_s21, 4  ;;  %s618_s11 = int_to_ptr.vmem [resolvable:$true] %s617_s11 }
  0x40   : > { %415 = vmatpush.msra.mxu3 %v412_v9  ;;  %376 = vmatpush.msra.mxu2 %v331_v8  ;;  %v350_v14 = vld [vmem:[#allocation5 + $0xe0] sm:$0xff]  ;;  %v349_v18 = vld [vmem:[#allocation5 + $0xd8] sm:$0xff]  ;;  %v328_v21 = vld [vmem:[#allocation5 + $0x50] sm:$0xff] }
  0x41   : > { %v410_v15 = vld [vmem:[#allocation5 + $0x160] sm:$0xff]  ;;  %356 = vmatpush.msra.mxu1 %v351_v10  ;;  %299 = vmatpush.msra.mxu0 %v291_v11  ;;  %v409_v19 = vld [vmem:[#allocation5 + $0x158] sm:$0xff]  ;;  %v348_v22 = vld [vmem:[#allocation5 + $0xd0] sm:$0xff] }
  0x42   : > { %416 = vmatpush.msra.mxu3 %v411_v13  ;;  %377 = vmatpush.msra.mxu2 %v330_v12  ;;  %v408_v23 = vld [vmem:[#allocation5 + $0x150] sm:$0xff]  ;;  %v288_v24 = vld [vmem:[#allocation7 + $0x48] sm:$0xff]  ;;  %v287_v28 = vld [vmem:[#allocation7 + $0x40] sm:$0xff] }
  0x43   : > { %357 = vmatpush.msra.mxu1 %v350_v14  ;;  %300 = vmatpush.msra.mxu0 %v290_v16  ;;  %v327_v25 = vld [vmem:[#allocation5 + $0x48] sm:$0xff]  ;;  %v326_v29 = vld [vmem:[#allocation5 + $0x40] sm:$0xff]  ;;  %v286_v32 = vld [vmem:[#allocation7 + $0x38] sm:$0xff]  ;;  %s615_s7 = scalar_lea.hbm %s1404_s27, %s771_s12 }
  0x44   : > { %417 = vmatpush.msra.mxu3 %v410_v15  ;;  %378 = vmatpush.msra.mxu2 %v329_v17  ;;  %v347_v26 = vld [vmem:[#allocation5 + $0xc8] sm:$0xff]  ;;  %v346_v30 = vld [vmem:[#allocation5 + $0xc0] sm:$0xff]  ;;  %v325_v33 = vld [vmem:[#allocation5 + $0x38] sm:$0xff]  ;;  %s619_s18 = sshll.u32 %s615_s7, 4  ;;  %s620_s18 = int_to_ptr.hbm [resolvable:$true] %s619_s18 }
  0x45   : > { %358 = vmatpush.msra.mxu1 %v349_v18  ;;  %301 = vmatpush.msra.mxu0 %v289_v20  ;;  %v407_v27 = vld [vmem:[#allocation5 + $0x148] sm:$0xff]  ;;  %v406_v31 = vld [vmem:[#allocation5 + $0x140] sm:$0xff]  ;;  %v345_v34 = vld [vmem:[#allocation5 + $0xb8] sm:$0xff]  ;;  %s1004_s8 = sshra.s32 %s620_s18, 4  ;;  %s1005_s8 = int_to_ptr.hbm [resolvable:$true] %s1004_s8 }
  0x46   : > { %418 = vmatpush.msra.mxu3 %v409_v19  ;;  %379 = vmatpush.msra.mxu2 %v328_v21  ;;  %v405_v35 = vld [vmem:[#allocation5 + $0x138] sm:$0xff]  ;;  %v285_v36 = vld [vmem:[#allocation7 + $0x30] sm:$0xff]  ;;  %v284_v40 = vld [vmem:[#allocation7 + $0x28] sm:$0xff]  ;;  %s1006_s5 = scalar_lea.hbm %s1005_s8, 8  ;;  %p1011_p0 = scmp.lt.s32.totalorder %s1005_s8, %s1404_s27 }
  0x47   : > { %359 = vmatpush.msra.mxu1 %v348_v22  ;;  %302 = vmatpush.msra.mxu0 %v288_v24  ;;  %v324_v37 = vld [vmem:[#allocation5 + $0x30] sm:$0xff]  ;;  %v323_v41 = vld [vmem:[#allocation5 + $0x28] sm:$0xff]  ;;  %v283_v44 = vld [vmem:[#allocation7 + $0x20] sm:$0xff]  ;;  %p1007_p1 = scmp.ne.s32.totalorder %s1005_s8, %s1006_s5 }
  0x48   : > { %419 = vmatpush.msra.mxu3 %v408_v23  ;;  %380 = vmatpush.msra.mxu2 %v327_v25  ;;  %v344_v38 = vld [vmem:[#allocation5 + $0xb0] sm:$0xff]  ;;  %v343_v42 = vld [vmem:[#allocation5 + $0xa8] sm:$0xff]  ;;  %v322_v45 = vld [vmem:[#allocation5 + $0x20] sm:$0xff] }
  0x49   : > { %360 = vmatpush.msra.mxu1 %v347_v26  ;;  %303 = vmatpush.msra.mxu0 %v287_v28  ;;  %v404_v39 = vld [vmem:[#allocation5 + $0x130] sm:$0xff]  ;;  %v403_v43 = vld [vmem:[#allocation5 + $0x128] sm:$0xff]  ;;  %v342_v46 = vld [vmem:[#allocation5 + $0xa0] sm:$0xff]  ;;  %p1008_p4 = pnand %p1007_p1, %p1217_p6 }
  0x4a   : > { %420 = vmatpush.msra.mxu3 %v407_v27  ;;  %381 = vmatpush.msra.mxu2 %v326_v29  ;;  %v402_v47 = vld [vmem:[#allocation5 + $0x120] sm:$0xff]  ;;  %v282_v48 = vld [vmem:[#allocation7 + $0x18] sm:$0xff]  ;;  %v281_v52 = vld [vmem:[#allocation7 + $0x10] sm:$0xff] }
  0x4b   : > { %361 = vmatpush.msra.mxu1 %v346_v30  ;;  %304 = vmatpush.msra.mxu0 %v286_v32  ;;  %v321_v49 = vld [vmem:[#allocation5 + $0x18] sm:$0xff]  ;;  %v320_v53 = vld [vmem:[#allocation5 + $0x10] sm:$0xff]  ;;  %v280_v56 = vld [vmem:[#allocation7 + $0x8] sm:$0xff]  ;;  %p1009_p11 = pneg %p1008_p4 }
  0x4c   : > { %421 = vmatpush.msra.mxu3 %v406_v31  ;;  %382 = vmatpush.msra.mxu2 %v325_v33  ;;  %v341_v50 = vld [vmem:[#allocation5 + $0x98] sm:$0xff]  ;;  %v340_v54 = vld [vmem:[#allocation5 + $0x90] sm:$0xff]  ;;  %v319_v57 = vld [vmem:[#allocation5 + $0x8] sm:$0xff] }
  0x4d   : > { %362 = vmatpush.msra.mxu1 %v345_v34  ;;  %305 = vmatpush.msra.mxu0 %v285_v36  ;;  %v401_v51 = vld [vmem:[#allocation5 + $0x118] sm:$0xff]  ;;  %v400_v55 = vld [vmem:[#allocation5 + $0x110] sm:$0xff]  ;;  %v339_v58 = vld [vmem:[#allocation5 + $0x88] sm:$0xff] }
  0x4e   : > { %422 = vmatpush.msra.mxu3 %v405_v35  ;;  %383 = vmatpush.msra.mxu2 %v324_v37  ;;  %v399_v59 = vld [vmem:[#allocation5 + $0x108] sm:$0xff]  ;;  %v279_v60 = vld [vmem:[#allocation7] sm:$0xff]  ;;  %v454_v62 = vld [vmem:[#allocation5 + $0x1f8] sm:$0xff] }
  0x4f   : > { %363 = vmatpush.msra.mxu1 %v344_v38  ;;  %306 = vmatpush.msra.mxu0 %v284_v40  ;;  %v318_v61 = vld [vmem:[#allocation5] sm:$0xff]  ;;  %v536_v63 = vld [vmem:[#allocation5 + $0x2f8] sm:$0xff]  ;;  %v453_v2 = vld [vmem:[#allocation5 + $0x1f0] sm:$0xff] }
  0x50   : > { %423 = vmatpush.msra.mxu3 %v404_v39  ;;  %384 = vmatpush.msra.mxu2 %v323_v41  ;;  %v338_v0 = vld [vmem:[#allocation5 + $0x80] sm:$0xff]  ;;  %v495_v3 = vld [vmem:[#allocation5 + $0x278] sm:$0xff]  ;;  %v535_v4 = vld [vmem:[#allocation5 + $0x2f0] sm:$0xff] }
  0x51   : > { %364 = vmatpush.msra.mxu1 %v343_v42  ;;  %307 = vmatpush.msra.mxu0 %v283_v44  ;;  %v398_v1 = vld [vmem:[#allocation5 + $0x100] sm:$0xff]  ;;  %v577_v5 = vld [vmem:[#allocation5 + $0x378] sm:$0xff]  ;;  %v452_v6 = vld [vmem:[#allocation5 + $0x1e8] sm:$0xff] }
  0x52   : > { %424 = vmatpush.msra.mxu3 %v403_v43  ;;  %385 = vmatpush.msra.mxu2 %v322_v45  ;;  %v494_v7 = vld [vmem:[#allocation5 + $0x270] sm:$0xff]  ;;  %v534_v8 = vld [vmem:[#allocation5 + $0x2e8] sm:$0xff]  ;;  %v451_v10 = vld [vmem:[#allocation5 + $0x1e0] sm:$0xff] }
  0x53   : > { %365 = vmatpush.msra.mxu1 %v342_v46  ;;  %308 = vmatpush.msra.mxu0 %v282_v48  ;;  %v576_v9 = vld [vmem:[#allocation5 + $0x370] sm:$0xff]  ;;  %v493_v11 = vld [vmem:[#allocation5 + $0x268] sm:$0xff]  ;;  %v533_v12 = vld [vmem:[#allocation5 + $0x2e0] sm:$0xff] }
  0x54   : > { %425 = vmatpush.msra.mxu3 %v402_v47  ;;  %386 = vmatpush.msra.mxu2 %v321_v49  ;;  %v575_v13 = vld [vmem:[#allocation5 + $0x368] sm:$0xff]  ;;  %v450_v14 = vld [vmem:[#allocation5 + $0x1d8] sm:$0xff]  ;;  %v492_v15 = vld [vmem:[#allocation5 + $0x260] sm:$0xff] }
  0x55   : > { %366 = vmatpush.msra.mxu1 %v341_v50  ;;  %309 = vmatpush.msra.mxu0 %v281_v52  ;;  %v266_v16 = vld [vmem:[%s1289_s26] sm:$0xff]  ;;  %v267_v17 = vld [vmem:[%s1289_s26 + $0x8] sm:$0xff]  ;;  %v268_v18 = vld [vmem:[%s1289_s26 + $0x10] sm:$0xff] }
  0x56   : > { %426 = vmatpush.msra.mxu3 %v401_v51  ;;  %387 = vmatpush.msra.mxu2 %v320_v53  ;;  %v532_v19 = vld [vmem:[#allocation5 + $0x2d8] sm:$0xff]  ;;  %v574_v20 = vld [vmem:[#allocation5 + $0x360] sm:$0xff]  ;;  %v270_v21 = vadd.f32 %v267_v17, %v266_v16  ;;  %v449_v22 = vld [vmem:[#allocation5 + $0x1d0] sm:$0xff] }
  0x57   : > { %367 = vmatpush.msra.mxu1 %v340_v54  ;;  %310 = vmatpush.msra.mxu0 %v280_v56  ;;  %v491_v23 = vld [vmem:[#allocation5 + $0x258] sm:$0xff]  ;;  %v531_v25 = vld [vmem:[#allocation5 + $0x2d0] sm:$0xff]  ;;  %v448_v28 = vld [vmem:[#allocation5 + $0x1c8] sm:$0xff] }
  0x58   : > { %427 = vmatpush.msra.mxu3 %v400_v55  ;;  %388 = vmatpush.msra.mxu2 %v319_v57  ;;  %v269_v24 = vld [vmem:[%s1289_s26 + $0x18] sm:$0xff]  ;;  %v271_v27 = vadd.f32 %v270_v21, %v268_v18  ;;  %v490_v29 = vld [vmem:[#allocation5 + $0x250] sm:$0xff]  ;;  %v530_v30 = vld [vmem:[#allocation5 + $0x2c8] sm:$0xff] }
  0x59   : > { %368 = vmatpush.msra.mxu1 %v339_v58  ;;  %311 = vmatpush.msra.mxu0 %v279_v60  ;;  %v573_v26 = vld [vmem:[#allocation5 + $0x358] sm:$0xff]  ;;  %v572_v31 = vld [vmem:[#allocation5 + $0x350] sm:$0xff]  ;;  %v447_v33 = vld [vmem:[#allocation5 + $0x1c0] sm:$0xff] }
  0x5a   : > { %428 = vmatpush.msra.mxu3 %v399_v59  ;;  %389 = vmatpush.msra.mxu2 %v318_v61  ;;  %v272_v32 = vadd.f32 %v271_v27, %v269_v24  ;;  %v489_v34 = vld [vmem:[#allocation5 + $0x248] sm:$0xff]  ;;  %v529_v35 = vld [vmem:[#allocation5 + $0x2c0] sm:$0xff]  ;;  %v446_v38 = vld [vmem:[#allocation5 + $0x1b8] sm:$0xff] }
  0x5b   : > { %455 = vmatpush.msrb.mxu0 %v454_v62  ;;  %369 = vmatpush.msra.mxu1 %v338_v0  ;;  %v571_v36 = vld [vmem:[#allocation5 + $0x348] sm:$0xff]  ;;  %v488_v39 = vld [vmem:[#allocation5 + $0x240] sm:$0xff]  ;;  %v528_v40 = vld [vmem:[#allocation5 + $0x2b8] sm:$0xff] }
  0x5c   : > { %537 = vmatpush.msrb.mxu2 %v536_v63  ;;  %429 = vmatpush.msra.mxu3 %v398_v1  ;;  %v273_v37 = vrot.slane %v272_v32, 4  ;;  %v570_v41 = vld [vmem:[#allocation5 + $0x340] sm:$0xff]  ;;  %v445_v43 = vld [vmem:[#allocation5 + $0x1b0] sm:$0xff]  ;;  %v487_v44 = vld [vmem:[#allocation5 + $0x238] sm:$0xff] }
  0x5d   : > { %456 = vmatpush.msrb.mxu0 %v453_v2  ;;  %496 = vmatpush.msrb.mxu1 %v495_v3  ;;  %v527_v45 = vld [vmem:[#allocation5 + $0x2b0] sm:$0xff]  ;;  %v569_v46 = vld [vmem:[#allocation5 + $0x338] sm:$0xff]  ;;  %v444_v48 = vld [vmem:[#allocation5 + $0x1a8] sm:$0xff] }
  0x5e   : > { %538 = vmatpush.msrb.mxu2 %v535_v4  ;;  %578 = vmatpush.msrb.mxu3 %v577_v5  ;;  %v274_v42 = vadd.f32 %v273_v37, %v272_v32  ;;  %v486_v49 = vld [vmem:[#allocation5 + $0x230] sm:$0xff]  ;;  %v526_v50 = vld [vmem:[#allocation5 + $0x2a8] sm:$0xff]  ;;  %v317_v53 = vld [vmem:[%s1305_s15] sm:$0xff] }
  0x5f   : > { %457 = vmatpush.msrb.mxu0 %v452_v6  ;;  %497 = vmatpush.msrb.mxu1 %v494_v7  ;;  %v568_v51 = vld [vmem:[#allocation5 + $0x330] sm:$0xff]  ;;  %v443_v54 = vld [vmem:[#allocation5 + $0x1a0] sm:$0xff]  ;;  %v485_v55 = vld [vmem:[#allocation5 + $0x228] sm:$0xff] }
  0x60   : > { %539 = vmatpush.msrb.mxu2 %v534_v8  ;;  %579 = vmatpush.msrb.mxu3 %v576_v9  ;;  %v275_v47 = vrot.slane %v274_v42, 2  ;;  %v525_v56 = vld [vmem:[#allocation5 + $0x2a0] sm:$0xff]  ;;  %v567_v58 = vld [vmem:[#allocation5 + $0x328] sm:$0xff]  ;;  %v442_v61 = vld [vmem:[#allocation5 + $0x198] sm:$0xff] }
  0x61   : > { %458 = vmatpush.msrb.mxu0 %v451_v10  ;;  %498 = vmatpush.msrb.mxu1 %v493_v11  ;;  %v760_v60 = vld [vmem:[%s1305_s15 + $0x5] sm:$0xff]  ;;  %v524_v63 = vld [vmem:[#allocation5 + $0x298] sm:$0xff]  ;;  %v441_v2 = vld [vmem:[#allocation5 + $0x190] sm:$0xff] }
  0x62   : > { %540 = vmatpush.msrb.mxu2 %v533_v12  ;;  %580 = vmatpush.msrb.mxu3 %v575_v13  ;;  %v276_v52 = vadd.f32 %v275_v47, %v274_v42  ;;  %v484_v62 = vld [vmem:[#allocation5 + $0x220] sm:$0xff]  ;;  %v483_v3 = vld [vmem:[#allocation5 + $0x218] sm:$0xff]  ;;  %v523_v4 = vld [vmem:[#allocation5 + $0x290] sm:$0xff] }
  0x63   : > { %459 = vmatpush.msrb.mxu0 %v450_v14  ;;  %499 = vmatpush.msrb.mxu1 %v492_v15  ;;  %v566_v0 = vld [vmem:[#allocation5 + $0x320] sm:$0xff]  ;;  %v565_v5 = vld [vmem:[#allocation5 + $0x318] sm:$0xff]  ;;  %v440_v6 = vld [vmem:[#allocation5 + $0x188] sm:$0xff] }
  0x64   : > { %541 = vmatpush.msrb.mxu2 %v532_v19  ;;  %581 = vmatpush.msrb.mxu3 %v574_v20  ;;  %v277_v57 = vrot.slane %v276_v52, 1  ;;  %v758_v1 = vld [vmem:[%s1305_s15 + $0x3] sm:$0xff]  ;;  %v482_v7 = vld [vmem:[#allocation5 + $0x210] sm:$0xff] }
  0x65   : > { %460 = vmatpush.msrb.mxu0 %v449_v22  ;;  %500 = vmatpush.msrb.mxu1 %v491_v23  ;;  %v522_v8 = vld [vmem:[#allocation5 + $0x288] sm:$0xff]  ;;  %v564_v9 = vld [vmem:[#allocation5 + $0x310] sm:$0xff]  ;;  %v439_v10 = vld [vmem:[#allocation5 + $0x180] sm:$0xff] }
  0x66   : > { %542 = vmatpush.msrb.mxu2 %v531_v25  ;;  %582 = vmatpush.msrb.mxu3 %v573_v26  ;;  %v278_v59 = vadd.f32 %v277_v57, %v276_v52  ;;  %v481_v11 = vld [vmem:[#allocation5 + $0x208] sm:$0xff]  ;;  %v521_v12 = vld [vmem:[#allocation5 + $0x280] sm:$0xff]  ;;  %v768_v19 = vld [vmem:[%s1305_s15 + $0x10] sm:$0xff] }
  0x67   : > { %461 = vmatpush.msrb.mxu0 %v448_v28  ;;  %501 = vmatpush.msrb.mxu1 %v490_v29  ;;  %v563_v13 = vld [vmem:[#allocation5 + $0x308] sm:$0xff]  ;;  %v480_v16 = vld [vmem:[#allocation5 + $0x200] sm:$0xff] }
  0x68   : > { %543 = vmatpush.msrb.mxu2 %v530_v30  ;;  %583 = vmatpush.msrb.mxu3 %v572_v31  ;;  %v762_v14 = vld [vmem:[%s1305_s15 + $0x8] sm:$0xff]  ;;  %v562_v17 = vld [vmem:[#allocation5 + $0x300] sm:$0xff] }
  0x69   : > { %462 = vmatpush.msrb.mxu0 %v447_v33  ;;  %502 = vmatpush.msrb.mxu1 %v489_v34  ;;  %v766_v15 = vld [vmem:[%s1305_s15 + $0xd] sm:$0xff]  ;;  %v295_v28 = vld [vmem:[%s1373_s3] sm:$0x1] }
  0x6a   : > { %544 = vmatpush.msrb.mxu2 %v529_v35  ;;  %584 = vmatpush.msrb.mxu3 %v571_v36  ;;  %v764_v18 = vld [vmem:[%s1305_s15 + $0xb] sm:$0xff]  ;;  %s1010_s15 = scalar_lea.hbm %s1404_s27, 32 }
  0x6b   : > { %463 = vmatpush.msrb.mxu0 %v446_v38  ;;  %503 = vmatpush.msrb.mxu1 %v488_v39  ;;  %p1012_p2 = scmp.lt.s32.totalorder %s1010_s15, %s1006_s5 }
  0x6c   : > { %545 = vmatpush.msrb.mxu2 %v528_v40  ;;  %585 = vmatpush.msrb.mxu3 %v570_v41 }
  0x6d   : > { %464 = vmatpush.msrb.mxu0 %v445_v43  ;;  %504 = vmatpush.msrb.mxu1 %v487_v44  ;;  %p1013_p3 = por %p1012_p2, %p1011_p0 }
  0x6e   : > { %546 = vmatpush.msrb.mxu2 %v527_v45  ;;  %586 = vmatpush.msrb.mxu3 %v569_v46 }
  0x6f   : > { %465 = vmatpush.msrb.mxu0 %v444_v48  ;;  %505 = vmatpush.msrb.mxu1 %v486_v49  ;;  %p1014_p5 = pnand %p1013_p3, %p1009_p11 }
  0x70   : > { %547 = vmatpush.msrb.mxu2 %v526_v50  ;;  %587 = vmatpush.msrb.mxu3 %v568_v51 }
  0x71   : > { %390 = vmatmul.f32.vlgmr.msra.gmra.mxu2 %v317_v53  ;;  %466 = vmatpush.msrb.mxu0 %v443_v54 }
  0x72   : > { %506 = vmatpush.msrb.mxu1 %v485_v55  ;;  %548 = vmatpush.msrb.mxu2 %v525_v56 }
  0x73   : > { %588 = vmatpush.msrb.mxu3 %v567_v58  ;;  %312 = vmatmul.f32.vlgmr.msra.gmra.mxu0 %v278_v59 }
  0x74   : > { %430 = vmatmul.f32.vlgmr.msra.gmra.mxu3 %v760_v60  ;;  %467 = vmatpush.msrb.mxu0 %v442_v61 }
  0x75   : > { %507 = vmatpush.msrb.mxu1 %v484_v62  ;;  %549 = vmatpush.msrb.mxu2 %v524_v63 }
  0x76   : > { %589 = vmatpush.msrb.mxu3 %v566_v0  ;;  %370 = vmatmul.f32.vlgmr.msra.gmra.mxu1 %v758_v1 }
  0x77   : > { %468 = vmatpush.msrb.mxu0 %v441_v2  ;;  %508 = vmatpush.msrb.mxu1 %v483_v3 }
  0x78   : > { %550 = vmatpush.msrb.mxu2 %v523_v4  ;;  %590 = vmatpush.msrb.mxu3 %v565_v5 }
  0x79   : > { %469 = vmatpush.msrb.mxu0 %v440_v6  ;;  %509 = vmatpush.msrb.mxu1 %v482_v7 }
  0x7a   : > { %551 = vmatpush.msrb.mxu2 %v522_v8  ;;  %591 = vmatpush.msrb.mxu3 %v564_v9 }
  0x7b   : > { %470 = vmatpush.msrb.mxu0 %v439_v10  ;;  %510 = vmatpush.msrb.mxu1 %v481_v11 }
  0x7c   : > { %552 = vmatpush.msrb.mxu2 %v521_v12  ;;  %592 = vmatpush.msrb.mxu3 %v563_v13 }
  0x7d   : > { %471 = vmatmul.f32.vlgmr.msrb.gmra.mxu0 %v762_v14  ;;  %553 = vmatmul.f32.vlgmr.msrb.gmra.mxu2 %v766_v15 }
  0x7e   : > { %511 = vmatpush.msrb.mxu1 %v480_v16  ;;  %593 = vmatpush.msrb.mxu3 %v562_v17 }
  0x7f   : > { %512 = vmatmul.f32.vlgmr.msrb.gmra.mxu1 %v764_v18  ;;  %594 = vmatmul.f32.vlgmr.msrb.gmra.mxu3 %v768_v19 }
  0xf0   : > { %v313_v20 = vpop.f32.mrf.mxu0 }
  0xf1   : > { %v314_v30 = vadd.f32 %v313_v20, %v295_v28 }
  0xf3   : > { %v371_v21 = vpop.f32.mrf.mxu1  ;;  %v599_v35 = vperm.slane %v314_v30, 0 }
  0xf4   : > { %v391_v22 = vpop.f32.mrf.mxu2 }
  0xf5   : > { %v392_v23 = vadd.f32 %v391_v22, %v371_v21 }
  0xf7   : > { %v431_v24 = vpop.f32.mrf.mxu3 }
  0xf8   : > { %v434_v25 = vadd.f32 %v431_v24, %v392_v23 }
  0xfa   : > { %v472_v26 = vpop.f32.mrf.mxu0 }
  0xfb   : > { %v475_v27 = vadd.f32 %v472_v26, %v434_v25 }
  0xfc   : > { %v513_v29 = vpop.f32.mrf.mxu1 }
  0xfd   : > { %v516_v31 = vadd.f32 %v513_v29, %v475_v27 }
 0x100   : > { %v554_v32 = vpop.f32.mrf.mxu2 }
 0x101   : > { %v557_v33 = vadd.f32 %v554_v32, %v516_v31 }
 0x102   : > { %v595_v34 = vpop.f32.mrf.mxu3 }
 0x103   : > { %v598_v36 = vadd.f32 %v595_v34, %v557_v33 }
 0x105   : > { %v600_v37 = vadd.f32 %v599_v35, %v598_v36 }
 0x107   : > { %601 = vst [vmem:[%s264_s21] sm:$0xff] %v600_v37 }
 0x108   : > { %1017 = shalt.err (!%p1014_p5)
}
 0x109   : > { %785 = dma.vmem_to_hbm [thread:$0]  (%p1217_p6), %s618_s11, 128, %s620_s18, %s603_s23  }
 0x10a PF: > { %s1406_s29 = sld [smem:[#allocation12_spill]]  ;;  %p807_p7 = scmp.ge.s32.totalorder %s1116_s25, 2 }
 0x10c   : > { %p799_p8 = pnand %p807_p7, %p1223_p10 }
 0x10e   : > { %p800_p9 = pneg %p799_p8 }
 0x110   : > { %s631_s10 = sand.u32 1, %s1406_s29  }
 0x111   : > { %s632_s9 = scalar_lea.sflag [#allocation4], %s631_s10 }
 0x112   : > { %1071 = dma.done.wait (%p800_p9), %s632_s9, 128  }
 0x113   : > { %1073 = vsyncadd (%p800_p9), %s632_s9, 4294967168  ;;  %s21_s25 = sadd.s32 1, %s1116_s25   ;;  %s1408_s21 = sld [smem:[#allocation13_spill]] }
 0x114   : > { %p18_p12 = scmp.ge.s32.totalorder %s21_s25, 6   ;;  %s1409_s23 = sld [smem:[#allocation16_spill]] }
 0x115   : > { %s1410_s12 = sld [smem:[#allocation17_spill]]  ;;  %s1411_s15 = smov %s1080_s16 }
 0x116   : > { %s1412_s16 = smov %s1084_s17  ;;  %s1413_s17 = smov %s1274_s2 }
 0x117   : > { %s1414_s18 = smov %s1092_s19  ;;  %s1415_s19 = smov %s1096_s20 }
 0x118   : > { %s1416_s20 = smov %s1271_s1  ;;  %s1417_s22 = smov %s1112_s24 }
 0x119   :  { %20 = sbr.rel (!%p18_p12) target bundleno = 14 (0xe), region = 102 }
 0x11b   : > { %s1418_s24 = smov %s1410_s12 }
 0x11e   :  { %638 = vsyncpa [#allocation3], 1 }
 0x11f   :  { %640 = vsyncpa [#allocation3 + $0x1], 1 }
 0x120   :  { %641 = vsyncpa [#allocation6], 1 }
 0x121   :  { %642 = vsyncpa [#allocation4], 1 }
 0x122   :  { %644 = vsyncpa [#allocation4 + $0x1], 1 }

</bundles_post_ra>
